<compile_context>
chip_gen: v7x
topology: tpu7x:2x2x1
jax: 0.10.0
libtpu: 0.0.40
codegen_flags: <defaults>
</compile_context>

<pallas_src>
import jax
import jax.numpy as jnp
from jax import lax
from jax.experimental import pallas as pl
from jax.experimental.pallas import tpu as pltpu

EPS = 1e-5
TN_PREF = 256   # output-feature tile (lane-dense, MXU-native)


def _tpu_vmem_capacity():
    try:
        return int(pltpu.get_tpu_info().vmem_capacity_bytes)
    except Exception:
        return 64 * 1024 * 1024  # conservative default (v7x per-TC VMEM)


def _pick_row_tile(rows, D, vmem_cap):
    """Row-tile size: bigger tiles raise W-streaming intensity (~ts flop/byte),
    capped by generation VMEM and by D so (ts, D) activation tiles stay bounded."""
    big_vmem = vmem_cap >= 100 * 1024 * 1024     # v5e/v6e (128 MiB) vs v7x (64 MiB)
    if big_vmem and D <= 4096:
        ts = 512
    elif (not big_vmem) and D >= 8192:
        ts = 128
    else:
        ts = 256
    if rows < ts:
        return rows          # small problem: full extent (always a legal block)
    return ts


def _pick_lane_tile(total, preferred=TN_PREF):
    """Lane-dim tile: multiple of 128 (unmasked vst) and bounded by `preferred`;
    never falls back to a huge full extent."""
    if total % 128 == 0:
        t = min(preferred, total)
        while total % t != 0:
            t -= 128
        return t
    if total > preferred:
        return preferred     # cdiv grid handles the masked partial last tile
    return total             # small / unaligned D_out: full extent is cheap & legal


def prenorm_linear_kernel(x_ref, gamma_ref, beta_ref, w_ref, b_ref, o_ref, y_ref):
    # Grid: (row tiles [outer, parallel], D_out tiles [inner, arbitrary]).
    # x_ref:      (ts, D)   f32/bf16 activations (fetched once per row tile)
    # gamma/beta: (1, D)    LayerNorm affine params
    # w_ref:      (D, tn)   bf16 weight tile (the streamed operand)
    # b_ref:      (1, tn)   bias tile
    # o_ref:      (ts, tn)  output tile
    # y_ref:      (ts, D)   bf16 scratch: normalized rows, carried across j.
    @pl.when(pl.program_id(1) == 0)
    def _():
        x = x_ref[...].astype(jnp.float32)
        mean = jnp.mean(x, axis=-1, keepdims=True)
        xc = x - mean                                   # two-pass: no cancellation
        var = jnp.mean(xc * xc, axis=-1, keepdims=True)
        inv = lax.rsqrt(var + EPS)
        y = xc * inv * gamma_ref[...].astype(jnp.float32) \
            + beta_ref[...].astype(jnp.float32)
        y_ref[...] = y.astype(y_ref.dtype)              # cast straight into bf16 scratch

    # fn: Linear(D -> D_out), bf16 MXU inputs with f32 accumulation.
    out = jnp.dot(y_ref[...], w_ref[...], preferred_element_type=jnp.float32)
    out = out + b_ref[...].astype(jnp.float32)
    o_ref[...] = out.astype(o_ref.dtype)


def prenorm_linear(x, gamma, beta, w, b):
    """PreNorm(dim, nn.Linear(dim, dim_out)) forward.

    x: (B, S, D); gamma/beta: (1, D); w: (D, D_out); b: (1, D_out).
    """
    B, S, D = x.shape
    D_out = w.shape[1]
    rows = B * S

    vmem_cap = _tpu_vmem_capacity()
    ts = _pick_row_tile(rows, D, vmem_cap)
    tn = _pick_lane_tile(D_out, TN_PREF)
    grid = (pl.cdiv(rows, ts), pl.cdiv(D_out, tn))   # rows OUTER, D_out INNER

    x2d = x.reshape(rows, D)
    w_bf16 = w.astype(jnp.bfloat16)   # cast once: halves weight HBM/VMEM traffic

    out_itemsize = jnp.dtype(x.dtype).itemsize
    cost = pl.CostEstimate(
        flops=2 * rows * D * D_out,
        transcendentals=0,
        bytes_accessed=(rows * D * x2d.dtype.itemsize
                        + D * D_out * 2
                        + rows * D_out * out_itemsize),
    )

    grid_spec = pltpu.PrefetchScalarGridSpec(
        num_scalar_prefetch=0,
        grid=grid,
        in_specs=[
            pl.BlockSpec((ts, D), lambda i, j: (i, 0)),   # x row tile (block idx const in j)
            pl.BlockSpec((1, D), lambda i, j: (0, 0)),    # gamma
            pl.BlockSpec((1, D), lambda i, j: (0, 0)),    # beta
            pl.BlockSpec((D, tn), lambda i, j: (0, j)),   # W tile (streamed operand)
            pl.BlockSpec((1, tn), lambda i, j: (0, j)),   # bias tile
        ],
        out_specs=pl.BlockSpec((ts, tn), lambda i, j: (i, j)),
        scratch_shapes=[pltpu.VMEM((ts, D), jnp.bfloat16)],  # cached normalized rows
    )

    out2d = pl.pallas_call(
        prenorm_linear_kernel,
        out_shape=jax.ShapeDtypeStruct((rows, D_out), x.dtype),
        grid_spec=grid_spec,
        compiler_params=pltpu.CompilerParams(
            # Row tiles are independent (megacore on v7x); the D_out axis carries
            # the LN scratch across its sweep, so it must stay "arbitrary".
            dimension_semantics=("parallel", "arbitrary"),
            vmem_limit_bytes=min(vmem_cap * 3 // 4, 96 * 1024 * 1024),
        ),
        cost_estimate=cost,
    )(x2d, gamma, beta, w_bf16, b)

    return out2d.reshape(B, S, D_out)
    # TODO(synk): for extremely large D (>= ~16K) add a K-axis split with a f32
    # accumulator + a full-D stats prologue; here the whole D stays resident.


def prenorm_linear_ref(x, gamma, beta, w, b):
    xf = x.astype(jnp.float32)
    mean = jnp.mean(xf, axis=-1, keepdims=True)
    var = jnp.mean((xf - mean) ** 2, axis=-1, keepdims=True)
    y = (xf - mean) * lax.rsqrt(var + EPS) * gamma[0] + beta[0]
    return (y @ w.astype(jnp.float32) + b[0]).astype(x.dtype)


def _run_check(B, S, D, D_out, key, tol):
    kx, kw = jax.random.split(key)
    x = jax.random.normal(kx, (B, S, D), dtype=jnp.float32)
    # Deterministic params (LayerNorm defaults perturbed so scale/shift are exercised).
    gamma = (jnp.ones((1, D), jnp.float32)
             + 0.01 * jnp.arange(D, dtype=jnp.float32)[None, :])
    beta = 0.02 * jnp.arange(D, dtype=jnp.float32)[None, :]
    w = jax.random.normal(kw, (D, D_out), dtype=jnp.float32) * 0.05
    b = 0.01 * jnp.arange(D_out, dtype=jnp.float32)[None, :]

    out = jax.block_until_ready(prenorm_linear(x, gamma, beta, w, b))
    ref = prenorm_linear_ref(x, gamma, beta, w, b)
    assert out.shape == (B, S, D_out)
    err = float(jnp.max(jnp.abs(out - ref)))
    # Tolerance accounts for bf16 MXU inputs (f32 accumulation) in the kernel.
    assert err < tol, f"max abs err {err} >= {tol}"


if __name__ == "__main__":
    key = jax.random.PRNGKey(0)
    k1, k2 = jax.random.split(key)

    # Small shapes matching the module: PreNorm(dim=32, fn=Linear(32, 32)).
    _run_check(B=2, S=8, D=32, D_out=32, key=k1, tol=2e-2)

    # Also exercise the tiled / LN-scratch-carry path (multiple row & N tiles).
    _run_check(B=2, S=512, D=128, D_out=512, key=k2, tol=6e-2)

    print("KERNEL_OK")
</pallas_src>

<mosaic_0001>
module attributes {stable_mosaic.version = 11 : i64} {
  func.func @prenorm_linear_kernel(%arg0: i32, %arg1: i32, %arg2: memref<16x32xf32, #tpu.memory_space<vmem>>, %arg3: memref<1x32xf32, #tpu.memory_space<vmem>>, %arg4: memref<1x32xf32, #tpu.memory_space<vmem>>, %arg5: memref<32x32xbf16, #tpu.memory_space<vmem>>, %arg6: memref<1x32xf32, #tpu.memory_space<vmem>>, %arg7: memref<16x32xf32, #tpu.memory_space<vmem>>, %arg8: memref<16x32xbf16, #tpu.memory_space<vmem>>) attributes {dimension_semantics = [#tpu.dimension_semantics<parallel>, #tpu.dimension_semantics<arbitrary>], iteration_bounds = array<i64: 1, 1>, scalar_prefetch = 0 : i64, scratch_operands = 1 : i64, tpu.core_type = #tpu.core_type<tc>, window_params = [{transform_indices = @transform_0, window_bounds = array<i64: 16, 32>}, {pipeline_mode = #tpu.pipeline_mode<synchronous>, transform_indices = @transform_1, window_bounds = array<i64: 1, 32>}, {pipeline_mode = #tpu.pipeline_mode<synchronous>, transform_indices = @transform_2, window_bounds = array<i64: 1, 32>}, {transform_indices = @transform_3, window_bounds = array<i64: 32, 32>}, {transform_indices = @transform_4, window_bounds = array<i64: 1, 32>}, {transform_indices = @transform_5, window_bounds = array<i64: 16, 32>}]} {
    %c0_i32 = arith.constant 0 : i32
    %0 = arith.cmpi eq, %arg1, %c0_i32 : i32
    %1 = arith.extui %0 : i1 to i32
    %c0_i32_0 = arith.constant 0 : i32
    %2 = arith.cmpi ne, %1, %c0_i32_0 : i32
    scf.if %2 {
      %c0_8 = arith.constant 0 : index
      %c0_9 = arith.constant 0 : index
      %10 = vector.load %arg2[%c0_8, %c0_9] : memref<16x32xf32, #tpu.memory_space<vmem>>, vector<16x32xf32>
      %cst_10 = arith.constant dense<0.000000e+00> : vector<16xf32>
      %11 = vector.multi_reduction <add>, %10, %cst_10 [1] : vector<16x32xf32> to vector<16xf32>
      %12 = vector.shape_cast %11 : vector<16xf32> to vector<16x1xf32>
      %cst_11 = arith.constant 3.200000e+01 : f32
      %13 = vector.broadcast %cst_11 : f32 to vector<16x1xf32>
      %14 = arith.divf %12, %13 : vector<16x1xf32>
      %15 = vector.broadcast %14 : vector<16x1xf32> to vector<16x32xf32>
      %16 = arith.subf %10, %15 : vector<16x32xf32>
      %17 = arith.mulf %16, %16 : vector<16x32xf32>
      %cst_12 = arith.constant dense<0.000000e+00> : vector<16xf32>
      %18 = vector.multi_reduction <add>, %17, %cst_12 [1] : vector<16x32xf32> to vector<16xf32>
      %19 = vector.shape_cast %18 : vector<16xf32> to vector<16x1xf32>
      %cst_13 = arith.constant 3.200000e+01 : f32
      %20 = vector.broadcast %cst_13 : f32 to vector<16x1xf32>
      %21 = arith.divf %19, %20 : vector<16x1xf32>
      %cst_14 = arith.constant 9.99999974E-6 : f32
      %22 = vector.broadcast %cst_14 : f32 to vector<16x1xf32>
      %23 = arith.addf %21, %22 : vector<16x1xf32>
      %24 = math.rsqrt %23 : vector<16x1xf32>
      %25 = vector.broadcast %24 : vector<16x1xf32> to vector<16x32xf32>
      %26 = arith.mulf %16, %25 : vector<16x32xf32>
      %c0_15 = arith.constant 0 : index
      %c0_16 = arith.constant 0 : index
      %27 = vector.load %arg3[%c0_15, %c0_16] : memref<1x32xf32, #tpu.memory_space<vmem>>, vector<1x32xf32>
      %28 = vector.broadcast %27 : vector<1x32xf32> to vector<16x32xf32>
      %29 = arith.mulf %26, %28 : vector<16x32xf32>
      %c0_17 = arith.constant 0 : index
      %c0_18 = arith.constant 0 : index
      %30 = vector.load %arg4[%c0_17, %c0_18] : memref<1x32xf32, #tpu.memory_space<vmem>>, vector<1x32xf32>
      %31 = vector.broadcast %30 : vector<1x32xf32> to vector<16x32xf32>
      %32 = arith.addf %29, %31 : vector<16x32xf32>
      %33 = arith.truncf %32 : vector<16x32xf32> to vector<16x32xbf16>
      %c0_19 = arith.constant 0 : index
      %c0_20 = arith.constant 0 : index
      %34 = vector.load %arg8[%c0_19, %c0_20] : memref<16x32xbf16, #tpu.memory_space<vmem>>, vector<16x32xbf16>
      tpu.vector_store %arg8[%c0_19, %c0_20], %33 {strides = array<i32>} : memref<16x32xbf16, #tpu.memory_space<vmem>>, vector<16x32xbf16>,
    } else {
    }
    %c0 = arith.constant 0 : index
    %c0_1 = arith.constant 0 : index
    %3 = vector.load %arg8[%c0, %c0_1] : memref<16x32xbf16, #tpu.memory_space<vmem>>, vector<16x32xbf16>
    %c0_2 = arith.constant 0 : index
    %c0_3 = arith.constant 0 : index
    %4 = vector.load %arg5[%c0_2, %c0_3] : memref<32x32xbf16, #tpu.memory_space<vmem>>, vector<32x32xbf16>
    %cst = arith.constant dense<0.000000e+00> : vector<16x32xf32>
    %5 = tpu.matmul %3, %4, %cst {dimension_numbers = #tpu.dot_dimension_numbers<[1], [0], [0], [1], [0, 0, 1, 1], [], []>} : vector<16x32xbf16>, vector<32x32xbf16>, vector<16x32xf32> -> vector<16x32xf32>
    %c0_4 = arith.constant 0 : index
    %c0_5 = arith.constant 0 : index
    %6 = vector.load %arg6[%c0_4, %c0_5] : memref<1x32xf32, #tpu.memory_space<vmem>>, vector<1x32xf32>
    %7 = vector.broadcast %6 : vector<1x32xf32> to vector<16x32xf32>
    %8 = arith.addf %5, %7 : vector<16x32xf32>
    %c0_6 = arith.constant 0 : index
    %c0_7 = arith.constant 0 : index
    %9 = vector.load %arg7[%c0_6, %c0_7] : memref<16x32xf32, #tpu.memory_space<vmem>>, vector<16x32xf32>
    tpu.vector_store %arg7[%c0_6, %c0_7], %8 {strides = array<i32>} : memref<16x32xf32, #tpu.memory_space<vmem>>, vector<16x32xf32>,
    return
  }
  func.func @transform_0(%arg0: i32, %arg1: i32) -> (i32, i32) {
    %c0_i32 = arith.constant 0 : i32
    %c0_i32_0 = arith.constant 0 : i32
    return %arg0, %c0_i32 : i32, i32
  }
  func.func @transform_1(%arg0: i32, %arg1: i32) -> (i32, i32) {
    %c0_i32 = arith.constant 0 : i32
    %c0_i32_0 = arith.constant 0 : i32
    %c0_i32_1 = arith.constant 0 : i32
    return %c0_i32, %c0_i32_0 : i32, i32
  }
  func.func @transform_2(%arg0: i32, %arg1: i32) -> (i32, i32) {
    %c0_i32 = arith.constant 0 : i32
    %c0_i32_0 = arith.constant 0 : i32
    %c0_i32_1 = arith.constant 0 : i32
    return %c0_i32, %c0_i32_0 : i32, i32
  }
  func.func @transform_3(%arg0: i32, %arg1: i32) -> (i32, i32) {
    %c0_i32 = arith.constant 0 : i32
    %c0_i32_0 = arith.constant 0 : i32
    return %c0_i32, %arg1 : i32, i32
  }
  func.func @transform_4(%arg0: i32, %arg1: i32) -> (i32, i32) {
    %c0_i32 = arith.constant 0 : i32
    %c0_i32_0 = arith.constant 0 : i32
    return %c0_i32, %arg1 : i32, i32
  }
  func.func @transform_5(%arg0: i32, %arg1: i32) -> (i32, i32) {
    %c0_i32 = arith.constant 0 : i32
    return %arg0, %arg1 : i32, i32
  }
}

</mosaic_0001>

<bundles_post_ra>
// kernel: tpu_custom_call.1
= control target key start
LH: loop header
LB: loop body
LE: loop exit
PB: predicated region body
PF: predicated region fallthrough
CT: control target
= control target key end

     0   :  { %10 = vsyncpa [#allocation4], 0  ;;  %s395_s0 = inlined_call_operand.hbm [shape: f32[16,32], index: 0, kind: input, shape index: {}]   ;;  %s396_s1 = inlined_call_operand.vmem [shape: f32[1,32], index: 1, kind: input, shape index: {}]   ;;  %s397_s2 = inlined_call_operand.vmem [shape: f32[1,32], index: 2, kind: input, shape index: {}]   ;;  %s398_s3 = inlined_call_operand.hbm [shape: bf16[32,32], index: 3, kind: input, shape index: {}]   ;;  %s399_s4 = inlined_call_operand.vmem [shape: f32[1,32], index: 4, kind: input, shape index: {}]   ;;  %s400_s5 = inlined_call_operand.hbm [shape: f32[16,32], index: 5, kind: output, shape index: {}]  }
   0x1   :  { %11 = vsyncpa [#allocation7], 0 }
   0x2   :  { %12 = vsyncpa [#allocation5], 0  ;;  %s297_s18 = smov [#allocation3]   ;;  %s225_s22 = scalar_lea.hbm %s395_s0, 256 }
   0x3   :  { %s18_s19 = sshll.u32 %s297_s18, 4  ;;  %p226_p0 = scmp.ne.s32.totalorder %s395_s0, %s225_s22  ;;  %s19_s19 = int_to_ptr.vmem [resolvable:$true] %s18_s19 }
   0x4   :  { %p229_p1 = scmp.lt.u32.totalorder %s225_s22, %s395_s0 }
   0x6   :  { %p231_p2 = pnand %p229_p1, %p226_p0 }
   0x8   :  { %234 = shalt.err (!%p231_p2)
}
   0x9   :  { %s235_s27 = scalar_lea.vmem %s19_s19, 256  ;;  %p240_p4 = scmp.lt.s32.totalorder %s19_s19, %s19_s19 }
   0xa   :  { %p236_p3 = scmp.ne.s32.totalorder %s19_s19, %s235_s27  ;;  %p241_p5 = scmp.lt.s32.totalorder %s235_s27, %s235_s27 }
   0xc   :  { %p242_p6 = por %p241_p5, %p240_p4 }
   0xe   :  { %p243_p7 = pnand %p242_p6, %p236_p3 }
  0x10   :  { %246 = shalt.err (!%p243_p7)
}
  0x11   :  { %s298_s28 = smov 128   ;;  %s299_s29 = smov 8  }
  0x12   :  { %24 = dma.hbm_to_vmem [thread:$0]  %s395_s0, 256, %s19_s19, [#allocation4], %s298_s28, %s298_s28, %s299_s29  }
  0x13   :  { %s300_s7 = smov [#allocation6]   ;;  %s247_s11 = scalar_lea.hbm %s398_s3, 256 }
  0x14   :  { %s34_s8 = sshll.u32 %s300_s7, 4  ;;  %p248_p8 = scmp.ne.s32.totalorder %s398_s3, %s247_s11  ;;  %s35_s8 = int_to_ptr.vmem [resolvable:$true] %s34_s8 }
  0x15   :  { %p251_p9 = scmp.lt.u32.totalorder %s247_s11, %s398_s3 }
  0x17   :  { %p253_p10 = pnand %p251_p9, %p248_p8 }
  0x19   :  { %256 = shalt.err (!%p253_p10)
}
  0x1a   :  { %s257_s16 = scalar_lea.vmem %s35_s8, 256  ;;  %p262_p12 = scmp.lt.s32.totalorder %s35_s8, %s35_s8 }
  0x1b   :  { %p258_p11 = scmp.ne.s32.totalorder %s35_s8, %s257_s16  ;;  %p263_p13 = scmp.lt.s32.totalorder %s257_s16, %s257_s16 }
  0x1d   :  { %p264_p0 = por %p263_p13, %p262_p12 }
  0x1f   :  { %p265_p1 = pnand %p264_p0, %p258_p11 }
  0x21   :  { %268 = shalt.err (!%p265_p1)
}
  0x22   :  { %s301_s0 = smov 64   ;;  %s302_s17 = smov 4  }
  0x23   :  { %40 = dma.hbm_to_vmem [thread:$0]  %s398_s3, 256, %s35_s8, [#allocation7], %s301_s0, %s301_s0, %s302_s17  }
  0x24   :  { %291 = dma.done.wait [#allocation4], 256  }
  0x25   :  { %292 = vsyncadd [#allocation4], 4294967040 }
  0x26   :  { %293 = dma.done.wait [#allocation7], 256  }
  0x27   :  { %294 = vsyncadd [#allocation7], 4294967040  ;;  %vm56_vm0 = vcmask 261120   ;;  %v54_v0 = vld [vmem:[#allocation3] sm:$0xff]  ;;  %v55_v1 = vld [vmem:[#allocation3 + $0x8] sm:$0xff]  ;;  %v303_v15 = vmov 0.0  }
  0x28   :  { %v57_v2 = vsel %vm56_vm0, %v54_v0, 0.0  ;;  %v60_v3 = vsel %vm56_vm0, %v55_v1, 0.0  ;;  %v219_v14 = vld [vmem:[#allocation6] sm:$0xff]   ;;  %202 = vmatprep.subr.bf16.mxu0 %v303_v15  ;;  %v220_v16 = vld [vmem:[#allocation6 + $0x8] sm:$0xff]   ;;  %vm304_vm1 = vmmov 0  }
  0x29   :  { %58 = vadd.xlane.f32.xlu0 %v57_v2  ;;  %203 = vmatpush3.bf16.msra.mxu0 %v219_v14  ;;  %v193_v25 = vld [vmem:[%s396_s1] ss:$0 sm:$0xff]  ;;  %s305_s1 = smov [#allocation8]  }
  0x2a   :  { %206 = vmatprep.mubr.msk.bf16.mxu0 %vm304_vm1, %v303_v15  ;;  %204 = vmatprep.subr.bf16.mxu0 %v303_v15  ;;  %v194_v29 = vld [vmem:[%s397_s2] ss:$0 sm:$0xff]  ;;  %s180_s25 = sshll.u32 %s305_s1, 4  ;;  %s181_s25 = int_to_ptr.vmem [resolvable:$true] %s180_s25 }
  0x2b   :  { %v195_v35 = vld [vmem:[%s399_s4] ss:$0 sm:$0xff]  ;;  %s269_s2 = scalar_lea.vmem %s181_s25, 256  ;;  %p274_p3 = scmp.lt.s32.totalorder %s181_s25, %s181_s25 }
  0x2c   :  { %p270_p2 = scmp.ne.s32.totalorder %s181_s25, %s269_s2  ;;  %p275_p4 = scmp.lt.s32.totalorder %s269_s2, %s269_s2 }
  0x2d   :  { %61 = vadd.xlane.f32.xlu0 %v60_v3  ;;  %205 = vmatpush3.bf16.msra.mxu0 %v220_v16 }
  0x2e   :  { %p276_p5 = por %p275_p4, %p274_p3 }
  0x30   :  { %p277_p6 = pnand %p276_p5, %p270_p2 }
  0xb6   :  { %v59_v4 = vpop.xlane.xlu0 %58 }
  0xb7   :  { %v64_v5 = vmul.f32 0.03125, %v59_v4 }
  0xb9   :  { %v66_v6 = vsub.f32 %v54_v0, %v64_v5 }
  0xba   :  { %v62_v7 = vpop.xlane.xlu0 %61 }
  0xbb   :  { %v65_v8 = vmul.f32 0.03125, %v62_v7  ;;  %v68_v9 = vmul.f32 %v66_v6, %v66_v6 }
  0xbd   :  { %v67_v10 = vsub.f32 %v55_v1, %v65_v8  ;;  %v70_v11 = vsel %vm56_vm0, %v68_v9, 0.0 }
  0xbe   :  { %71 = vadd.xlane.f32.xlu1 %v70_v11 }
  0xbf   :  { %v69_v12 = vmul.f32 %v67_v10, %v67_v10 }
  0xc1   :  { %v73_v13 = vsel %vm56_vm0, %v69_v12, 0.0 }
  0xc2   :  { %74 = vadd.xlane.f32.xlu1 %v73_v13 }
 0x14b   :  { %v72_v17 = vpop.xlane.xlu1 %71 }
 0x14c   :  { %v76_v18 = vmul.f32 0.03125, %v72_v17 }
 0x14e   :  { %v78_v19 = vadd.f32 1e-05, %v76_v18 }
 0x14f   :  { %v75_v20 = vpop.xlane.xlu1 %74 }
 0x150   :  { %221 = vrsqrt.f32 %v78_v19  ;;  %v77_v21 = vmul.f32 0.03125, %v75_v20 }
 0x152   :  { %v79_v22 = vadd.f32 1e-05, %v77_v21 }
 0x154   :  { %223 = vrsqrt.f32 %v79_v22 }
 0x15a   :  { %v222_v23 = vpop.eup %221 }
 0x15b   :  { %v82_v24 = vmul.f32 %v222_v23, %v66_v6 }
 0x15d   :  { %v91_v27 = vmul.f32 %v193_v25, %v82_v24 }
 0x15e   :  { %v224_v26 = vpop.eup %223 }
 0x15f   :  { %v83_v28 = vmul.f32 %v224_v26, %v67_v10  ;;  %v100_v31 = vadd.f32 %v194_v29, %v91_v27 }
 0x161   :  { %v92_v30 = vmul.f32 %v193_v25, %v83_v28 }
 0x163   :  { %v101_v32 = vadd.f32 %v194_v29, %v92_v30 }
 0x165   :  { %v102_v33 = vpack.c.bf16 %v101_v32, %v100_v31 }
 0x167   :  { %103 = vst.msk [vmem:[#allocation2] sm:$0xff] %vm56_vm0, %v102_v33 }
 0x16e   :  { %v104_v34 = vld [vmem:[#allocation2] sm:$0xff] }
 0x16f   :  { %207 = vmatmul.mubr.msk.bf16.vlgmr.msra.gmra.mrb[0].mxu0 %vm56_vm0, %v104_v34 }
 0x242   :  { %v166_v36 = vpop.f32.mrb[0].mxu0 }
 0x243   :  { %v167_v37 = vadd.f32 %v195_v35, %v166_v36  ;;  %v208_v38 = vpop.f32.mrb[1].mxu0 }
 0x244   :  { %v169_v39 = vpop.f32.mrb[2].mxu0 }
 0x245   :  { %173 = vst.msk [vmem:[#allocation8] sm:$0xff] %vm56_vm0, %v167_v37  ;;  %v170_v40 = vadd.f32 %v195_v35, %v169_v39  ;;  %v209_v41 = vpop.f32.mrb[3].mxu0 }
 0x247   :  { %174 = vst.msk [vmem:[#allocation8 + $0x8] sm:$0xff] %vm56_vm0, %v170_v40 }
 0x248   :  { %280 = shalt.err (!%p277_p6)
}
 0x249   :  { %s281_s27 = scalar_lea.hbm %s400_s5, 256 }
 0x24a   :  { %p282_p7 = scmp.ne.s32.totalorder %s400_s5, %s281_s27  ;;  %p285_p8 = scmp.lt.u32.totalorder %s281_s27, %s400_s5 }
 0x24c   :  { %p287_p9 = pnand %p285_p8, %p282_p7 }
 0x24e   :  { %290 = shalt.err (!%p287_p9)
}
 0x24f   :  { %186 = dma.vmem_to_hbm [thread:$0]  %s181_s25, 256, %s400_s5, [#allocation5], %s298_s28, %s298_s28, %s299_s29  }
 0x250   :  { %295 = dma.done.wait [#allocation5], 256  }
 0x251   :  { %296 = vsyncadd [#allocation5], 4294967040 }
 0x252   :  { %190 = vsyncpa [#allocation4], 1 }
 0x253   :  { %191 = vsyncpa [#allocation7], 1 }
 0x254   :  { %192 = vsyncpa [#allocation5], 1 }

</bundles_post_ra>
